<compile_context>
chip_gen: v7x
topology: tpu7x:2x2x1
jax: 0.10.0
libtpu: 0.0.40
codegen_flags: <defaults>
</compile_context>

<pallas_src>
import jax
import jax.numpy as jnp
from jax import lax
from jax.experimental import pallas as pl
from jax.experimental.pallas import tpu as pltpu


def _round_up(n, m):
    return ((n + m - 1) // m) * m


def _fused_lm_kernel(ids_ref,            # SMEM  [B_pad, 5] int32 (scalar prefetch)
                     emb_ref,            # VMEM  [V, E]       f32 embedding table
                     w1_ref, b1_ref,     # VMEM  [5E, H1p] bf16, [1, H1p] f32
                     w2_ref, b2_ref,     # VMEM  [H1p, H2p] bf16, [1, H2p] f32
                     w3_ref, b3_ref,     # VMEM  [H2p, Vp]  bf16, [1, Vp]  f32
                     out_ref,            # VMEM  [TB, Vp]     f32 (lane-dense)
                     emb_scratch):       # VMEM  [TB, 5E]     f32
    tb = out_ref.shape[0]                # batch-tile rows (static)
    n_ctx = ids_ref.shape[1]             # 5-gram context (static)
    e = emb_ref.shape[1]                 # embedding dim (static)
    base = pl.program_id(0) * tb         # global batch offset of this tile

    # Fused embedding gather + flatten (PyTorch: embedding(x).view(B, -1)).
    # Token ids are scalars in SMEM; embedding rows are dynamically sliced
    # from the VMEM-resident table and written at static column offsets p*E.
    # Every column of emb_scratch is written each step, so no zero-fill.
    def gather_row(b):
        for p in range(n_ctx):           # n_ctx=5, static unroll
            tok = ids_ref[base + b, p]
            emb_scratch[pl.ds(b, 1), p * e:(p + 1) * e] = \
                emb_ref[pl.ds(tok, 1), :]

    if tb <= 16:                         # small tile: full static unroll
        for b in range(tb):
            gather_row(b)
    else:                                # large tile: bounded code size
        def body(b, carry):
            gather_row(b)
            return carry
        lax.fori_loop(0, tb, body, 0)

    # fc1 -> relu   (bf16 MXU inputs, f32 accumulation, f32 bias/ReLU)
    x0 = emb_scratch[...].astype(jnp.bfloat16)
    h1 = jnp.dot(x0, w1_ref[...], preferred_element_type=jnp.float32)
    h1 = jnp.maximum(h1 + b1_ref[...], 0.0)

    # fc2 -> relu
    h2 = jnp.dot(h1.astype(jnp.bfloat16), w2_ref[...],
                 preferred_element_type=jnp.float32)
    h2 = jnp.maximum(h2 + b2_ref[...], 0.0)

    # fc3 (logits) — 128-wide lane-dense store; padded vocab cols are zero.
    out_ref[...] = jnp.dot(h2.astype(jnp.bfloat16), w3_ref[...],
                           preferred_element_type=jnp.float32) + b3_ref[...]


def init_params(key, vocab_size, embedding_dim, hidden_dim1, hidden_dim2):
    """Logical parameters with PyTorch-like shapes (Linear.weight = [out, in])."""
    k_emb, k1w, k1b, k2w, k2b, k3w, k3b = jax.random.split(key, 7)
    in1 = embedding_dim * 5

    def lin(kw, kb, fan_out, fan_in):
        bound = float(fan_in) ** -0.5
        w = jax.random.uniform(kw, (fan_out, fan_in), jnp.float32, -bound, bound)
        b = jax.random.uniform(kb, (fan_out,), jnp.float32, -bound, bound)
        return w, b

    params = {"embedding": jax.random.normal(
        k_emb, (vocab_size, embedding_dim), jnp.float32)}
    params["fc1_w"], params["fc1_b"] = lin(k1w, k1b, hidden_dim1, in1)
    params["fc2_w"], params["fc2_b"] = lin(k2w, k2b, hidden_dim2, hidden_dim1)
    params["fc3_w"], params["fc3_b"] = lin(k3w, k3b, vocab_size, hidden_dim2)
    return params


def pack_params(params, vocab_size, embedding_dim, hidden_dim1, hidden_dim2):
    """Transpose to [in, out], zero-pad outputs to 128-lane multiples, cast to bf16."""
    k = 5 * embedding_dim                    # contraction dim left un-padded
    h1_pad = _round_up(hidden_dim1, 128)
    h2_pad = _round_up(hidden_dim2, 128)
    v_pad = _round_up(vocab_size, 128)

    def pad_mat(w_t, rows, cols):
        return jnp.pad(w_t, ((0, rows - w_t.shape[0]), (0, cols - w_t.shape[1])))

    def pad_bias(b, cols):
        return jnp.pad(b.reshape(1, -1), ((0, 0), (0, cols - b.shape[0])))

    return {
        "emb": params["embedding"].astype(jnp.float32),                      # [V, E]
        "w1": pad_mat(params["fc1_w"].T, k, h1_pad).astype(jnp.bfloat16),    # [5E, H1p]
        "b1": pad_bias(params["fc1_b"], h1_pad).astype(jnp.float32),
        "w2": pad_mat(params["fc2_w"].T, h1_pad, h2_pad).astype(jnp.bfloat16),
        "b2": pad_bias(params["fc2_b"], h2_pad).astype(jnp.float32),
        "w3": pad_mat(params["fc3_w"].T, h2_pad, v_pad).astype(jnp.bfloat16),
        "b3": pad_bias(params["fc3_b"], v_pad).astype(jnp.float32),
    }


def neural_lm_forward(x, packed, vocab_size):
    """x: [B, 5] int32 token ids -> logits [B, vocab_size] float32."""
    b_logical, n_ctx = x.shape
    v_tbl, e = packed["emb"].shape
    k, h1_pad = packed["w1"].shape
    h2_pad, v_pad = packed["w3"].shape

    # Batch tiling: sublane multiple (8) at toy sizes, up to 128-row tiles at
    # real sizes; the grid axis is "parallel" so v7x can shard it over 2 TCs.
    tb = max(8, min(_round_up(b_logical, 8), 128))
    b_pad = _round_up(b_logical, tb)
    nb = b_pad // tb

    x_pad = jnp.zeros((b_pad, n_ctx), jnp.int32).at[:b_logical].set(
        x.astype(jnp.int32))

    grid_spec = pltpu.PrefetchScalarGridSpec(
        num_scalar_prefetch=1,                     # token ids -> SMEM
        grid=(nb,),
        in_specs=[
            pl.BlockSpec((v_tbl, e), lambda i, ids: (0, 0)),        # embedding
            pl.BlockSpec((k, h1_pad), lambda i, ids: (0, 0)),       # w1
            pl.BlockSpec((1, h1_pad), lambda i, ids: (0, 0)),       # b1
            pl.BlockSpec((h1_pad, h2_pad), lambda i, ids: (0, 0)),  # w2
            pl.BlockSpec((1, h2_pad), lambda i, ids: (0, 0)),       # b2
            pl.BlockSpec((h2_pad, v_pad), lambda i, ids: (0, 0)),   # w3
            pl.BlockSpec((1, v_pad), lambda i, ids: (0, 0)),        # b3
        ],
        out_specs=pl.BlockSpec((tb, v_pad), lambda i, ids: (i, 0)),
        scratch_shapes=[pltpu.VMEM((tb, k), jnp.float32)],
    )
    # TODO(synk): at realistic LM sizes (vocab ~32K+), add a second grid axis
    # tiling w3/b3/out over the vocab (N) dimension so the kernel stays within
    # v7x's 64 MiB VMEM instead of holding w3 as one full block.

    logits_pad = pl.pallas_call(
        _fused_lm_kernel,
        out_shape=jax.ShapeDtypeStruct((b_pad, v_pad), jnp.float32),
        grid_spec=grid_spec,
        compiler_params=pltpu.CompilerParams(
            dimension_semantics=("parallel",),
            vmem_limit_bytes=32 * 1024 * 1024),
    )(x_pad, packed["emb"], packed["w1"], packed["b1"],
      packed["w2"], packed["b2"], packed["w3"], packed["b3"])

    return logits_pad[:b_logical, :vocab_size]


def _reference_forward(x, packed, vocab_size):
    """Plain-JAX reference mirroring the kernel's bf16/f32-acc math."""
    emb_flat = jnp.take(packed["emb"], x, axis=0).reshape(x.shape[0], -1)
    h1 = jnp.maximum(
        jnp.dot(emb_flat.astype(jnp.bfloat16), packed["w1"],
                preferred_element_type=jnp.float32) + packed["b1"], 0.0)
    h2 = jnp.maximum(
        jnp.dot(h1.astype(jnp.bfloat16), packed["w2"],
                preferred_element_type=jnp.float32) + packed["b2"], 0.0)
    logits = jnp.dot(h2.astype(jnp.bfloat16), packed["w3"],
                     preferred_element_type=jnp.float32) + packed["b3"]
    return logits[:, :vocab_size]


if __name__ == "__main__":
    # Small, module-consistent shapes: 5-gram context, modest vocab/dims.
    vocab_size = 40
    embedding_dim = 32
    hidden_dim1 = 64
    hidden_dim2 = 64
    batch = 4

    key = jax.random.PRNGKey(0)
    k_params, k_x = jax.random.split(key)
    logical_params = init_params(k_params, vocab_size, embedding_dim,
                                 hidden_dim1, hidden_dim2)
    packed = pack_params(logical_params, vocab_size, embedding_dim,
                         hidden_dim1, hidden_dim2)
    x = jax.random.randint(k_x, (batch, 5), minval=0, maxval=vocab_size,
                           dtype=jnp.int32)

    out = jax.block_until_ready(neural_lm_forward(x, packed, vocab_size))
    ref = jax.block_until_ready(_reference_forward(x, packed, vocab_size))

    assert out.shape == (batch, vocab_size)
    max_err = float(jnp.max(jnp.abs(out - ref)))
    assert jnp.allclose(out, ref, atol=1e-3, rtol=1e-3), f"max_err={max_err}"

    print("KERNEL_OK")
</pallas_src>

<mosaic_0001>
module attributes {stable_mosaic.version = 11 : i64} {
  func.func @_fused_lm_kernel(%arg0: i32, %arg1: memref<8x5xi32, #tpu.memory_space<smem>>, %arg2: memref<40x32xf32, #tpu.memory_space<vmem>>, %arg3: memref<160x128xbf16, #tpu.memory_space<vmem>>, %arg4: memref<1x128xf32, #tpu.memory_space<vmem>>, %arg5: memref<128x128xbf16, #tpu.memory_space<vmem>>, %arg6: memref<1x128xf32, #tpu.memory_space<vmem>>, %arg7: memref<128x128xbf16, #tpu.memory_space<vmem>>, %arg8: memref<1x128xf32, #tpu.memory_space<vmem>>, %arg9: memref<8x128xf32, #tpu.memory_space<vmem>>, %arg10: memref<8x160xf32, #tpu.memory_space<vmem>>) attributes {dimension_semantics = [#tpu.dimension_semantics<parallel>], iteration_bounds = array<i64: 1>, scalar_prefetch = 1 : i64, scratch_operands = 1 : i64, tpu.core_type = #tpu.core_type<tc>, window_params = [{pipeline_mode = #tpu.pipeline_mode<synchronous>, transform_indices = @transform_0, window_bounds = array<i64: 40, 32>}, {pipeline_mode = #tpu.pipeline_mode<synchronous>, transform_indices = @transform_1, window_bounds = array<i64: 160, 128>}, {pipeline_mode = #tpu.pipeline_mode<synchronous>, transform_indices = @transform_2, window_bounds = array<i64: 1, 128>}, {pipeline_mode = #tpu.pipeline_mode<synchronous>, transform_indices = @transform_3, window_bounds = array<i64: 128, 128>}, {pipeline_mode = #tpu.pipeline_mode<synchronous>, transform_indices = @transform_4, window_bounds = array<i64: 1, 128>}, {pipeline_mode = #tpu.pipeline_mode<synchronous>, transform_indices = @transform_5, window_bounds = array<i64: 128, 128>}, {pipeline_mode = #tpu.pipeline_mode<synchronous>, transform_indices = @transform_6, window_bounds = array<i64: 1, 128>}, {transform_indices = @transform_7, window_bounds = array<i64: 8, 128>}]} {
    %c8_i32 = arith.constant 8 : i32
    %0 = arith.muli %arg0, %c8_i32 : i32
    %c0_i32 = arith.constant 0 : i32
    %1 = arith.addi %0, %c0_i32 : i32
    %2 = arith.index_cast %1 : i32 to index
    %c0 = arith.constant 0 : index
    %3 = memref.load %arg1[%2, %c0] : memref<8x5xi32, #tpu.memory_space<smem>>
    %4 = arith.index_cast %3 : i32 to index
    %c0_0 = arith.constant 0 : index
    %5 = vector.load %arg2[%4, %c0_0] : memref<40x32xf32, #tpu.memory_space<vmem>>, vector<1x32xf32>
    %c0_1 = arith.constant 0 : index
    %c0_2 = arith.constant 0 : index
    %6 = vector.load %arg10[%c0_1, %c0_2] : memref<8x160xf32, #tpu.memory_space<vmem>>, vector<1x32xf32>
    tpu.vector_store %arg10[%c0_1, %c0_2], %5 {strides = array<i32>} : memref<8x160xf32, #tpu.memory_space<vmem>>, vector<1x32xf32>,
    %c0_i32_3 = arith.constant 0 : i32
    %7 = arith.addi %0, %c0_i32_3 : i32
    %8 = arith.index_cast %7 : i32 to index
    %c1 = arith.constant 1 : index
    %9 = memref.load %arg1[%8, %c1] : memref<8x5xi32, #tpu.memory_space<smem>>
    %10 = arith.index_cast %9 : i32 to index
    %c0_4 = arith.constant 0 : index
    %11 = vector.load %arg2[%10, %c0_4] : memref<40x32xf32, #tpu.memory_space<vmem>>, vector<1x32xf32>
    %c0_5 = arith.constant 0 : index
    %c32 = arith.constant 32 : index
    %12 = vector.load %arg10[%c0_5, %c32] : memref<8x160xf32, #tpu.memory_space<vmem>>, vector<1x32xf32>
    tpu.vector_store %arg10[%c0_5, %c32], %11 {strides = array<i32>} : memref<8x160xf32, #tpu.memory_space<vmem>>, vector<1x32xf32>,
    %c0_i32_6 = arith.constant 0 : i32
    %13 = arith.addi %0, %c0_i32_6 : i32
    %14 = arith.index_cast %13 : i32 to index
    %c2 = arith.constant 2 : index
    %15 = memref.load %arg1[%14, %c2] : memref<8x5xi32, #tpu.memory_space<smem>>
    %16 = arith.index_cast %15 : i32 to index
    %c0_7 = arith.constant 0 : index
    %17 = vector.load %arg2[%16, %c0_7] : memref<40x32xf32, #tpu.memory_space<vmem>>, vector<1x32xf32>
    %c0_8 = arith.constant 0 : index
    %c64 = arith.constant 64 : index
    %18 = vector.load %arg10[%c0_8, %c64] : memref<8x160xf32, #tpu.memory_space<vmem>>, vector<1x32xf32>
    tpu.vector_store %arg10[%c0_8, %c64], %17 {strides = array<i32>} : memref<8x160xf32, #tpu.memory_space<vmem>>, vector<1x32xf32>,
    %c0_i32_9 = arith.constant 0 : i32
    %19 = arith.addi %0, %c0_i32_9 : i32
    %20 = arith.index_cast %19 : i32 to index
    %c3 = arith.constant 3 : index
    %21 = memref.load %arg1[%20, %c3] : memref<8x5xi32, #tpu.memory_space<smem>>
    %22 = arith.index_cast %21 : i32 to index
    %c0_10 = arith.constant 0 : index
    %23 = vector.load %arg2[%22, %c0_10] : memref<40x32xf32, #tpu.memory_space<vmem>>, vector<1x32xf32>
    %c0_11 = arith.constant 0 : index
    %c96 = arith.constant 96 : index
    %24 = vector.load %arg10[%c0_11, %c96] : memref<8x160xf32, #tpu.memory_space<vmem>>, vector<1x32xf32>
    tpu.vector_store %arg10[%c0_11, %c96], %23 {strides = array<i32>} : memref<8x160xf32, #tpu.memory_space<vmem>>, vector<1x32xf32>,
    %c0_i32_12 = arith.constant 0 : i32
    %25 = arith.addi %0, %c0_i32_12 : i32
    %26 = arith.index_cast %25 : i32 to index
    %c4 = arith.constant 4 : index
    %27 = memref.load %arg1[%26, %c4] : memref<8x5xi32, #tpu.memory_space<smem>>
    %28 = arith.index_cast %27 : i32 to index
    %c0_13 = arith.constant 0 : index
    %29 = vector.load %arg2[%28, %c0_13] : memref<40x32xf32, #tpu.memory_space<vmem>>, vector<1x32xf32>
    %c0_14 = arith.constant 0 : index
    %c128 = arith.constant 128 : index
    %30 = vector.load %arg10[%c0_14, %c128] : memref<8x160xf32, #tpu.memory_space<vmem>>, vector<1x32xf32>
    tpu.vector_store %arg10[%c0_14, %c128], %29 {strides = array<i32>} : memref<8x160xf32, #tpu.memory_space<vmem>>, vector<1x32xf32>,
    %c1_i32 = arith.constant 1 : i32
    %31 = arith.addi %0, %c1_i32 : i32
    %32 = arith.index_cast %31 : i32 to index
    %c0_15 = arith.constant 0 : index
    %33 = memref.load %arg1[%32, %c0_15] : memref<8x5xi32, #tpu.memory_space<smem>>
    %34 = arith.index_cast %33 : i32 to index
    %c0_16 = arith.constant 0 : index
    %35 = vector.load %arg2[%34, %c0_16] : memref<40x32xf32, #tpu.memory_space<vmem>>, vector<1x32xf32>
    %c1_17 = arith.constant 1 : index
    %c0_18 = arith.constant 0 : index
    %36 = vector.load %arg10[%c1_17, %c0_18] : memref<8x160xf32, #tpu.memory_space<vmem>>, vector<1x32xf32>
    tpu.vector_store %arg10[%c1_17, %c0_18], %35 {strides = array<i32>} : memref<8x160xf32, #tpu.memory_space<vmem>>, vector<1x32xf32>,
    %c1_i32_19 = arith.constant 1 : i32
    %37 = arith.addi %0, %c1_i32_19 : i32
    %38 = arith.index_cast %37 : i32 to index
    %c1_20 = arith.constant 1 : index
    %39 = memref.load %arg1[%38, %c1_20] : memref<8x5xi32, #tpu.memory_space<smem>>
    %40 = arith.index_cast %39 : i32 to index
    %c0_21 = arith.constant 0 : index
    %41 = vector.load %arg2[%40, %c0_21] : memref<40x32xf32, #tpu.memory_space<vmem>>, vector<1x32xf32>
    %c1_22 = arith.constant 1 : index
    %c32_23 = arith.constant 32 : index
    %42 = vector.load %arg10[%c1_22, %c32_23] : memref<8x160xf32, #tpu.memory_space<vmem>>, vector<1x32xf32>
    tpu.vector_store %arg10[%c1_22, %c32_23], %41 {strides = array<i32>} : memref<8x160xf32, #tpu.memory_space<vmem>>, vector<1x32xf32>,
    %c1_i32_24 = arith.constant 1 : i32
    %43 = arith.addi %0, %c1_i32_24 : i32
    %44 = arith.index_cast %43 : i32 to index
    %c2_25 = arith.constant 2 : index
    %45 = memref.load %arg1[%44, %c2_25] : memref<8x5xi32, #tpu.memory_space<smem>>
    %46 = arith.index_cast %45 : i32 to index
    %c0_26 = arith.constant 0 : index
    %47 = vector.load %arg2[%46, %c0_26] : memref<40x32xf32, #tpu.memory_space<vmem>>, vector<1x32xf32>
    %c1_27 = arith.constant 1 : index
    %c64_28 = arith.constant 64 : index
    %48 = vector.load %arg10[%c1_27, %c64_28] : memref<8x160xf32, #tpu.memory_space<vmem>>, vector<1x32xf32>
    tpu.vector_store %arg10[%c1_27, %c64_28], %47 {strides = array<i32>} : memref<8x160xf32, #tpu.memory_space<vmem>>, vector<1x32xf32>,
    %c1_i32_29 = arith.constant 1 : i32
    %49 = arith.addi %0, %c1_i32_29 : i32
    %50 = arith.index_cast %49 : i32 to index
    %c3_30 = arith.constant 3 : index
    %51 = memref.load %arg1[%50, %c3_30] : memref<8x5xi32, #tpu.memory_space<smem>>
    %52 = arith.index_cast %51 : i32 to index
    %c0_31 = arith.constant 0 : index
    %53 = vector.load %arg2[%52, %c0_31] : memref<40x32xf32, #tpu.memory_space<vmem>>, vector<1x32xf32>
    %c1_32 = arith.constant 1 : index
    %c96_33 = arith.constant 96 : index
    %54 = vector.load %arg10[%c1_32, %c96_33] : memref<8x160xf32, #tpu.memory_space<vmem>>, vector<1x32xf32>
    tpu.vector_store %arg10[%c1_32, %c96_33], %53 {strides = array<i32>} : memref<8x160xf32, #tpu.memory_space<vmem>>, vector<1x32xf32>,
    %c1_i32_34 = arith.constant 1 : i32
    %55 = arith.addi %0, %c1_i32_34 : i32
    %56 = arith.index_cast %55 : i32 to index
    %c4_35 = arith.constant 4 : index
    %57 = memref.load %arg1[%56, %c4_35] : memref<8x5xi32, #tpu.memory_space<smem>>
    %58 = arith.index_cast %57 : i32 to index
    %c0_36 = arith.constant 0 : index
    %59 = vector.load %arg2[%58, %c0_36] : memref<40x32xf32, #tpu.memory_space<vmem>>, vector<1x32xf32>
    %c1_37 = arith.constant 1 : index
    %c128_38 = arith.constant 128 : index
    %60 = vector.load %arg10[%c1_37, %c128_38] : memref<8x160xf32, #tpu.memory_space<vmem>>, vector<1x32xf32>
    tpu.vector_store %arg10[%c1_37, %c128_38], %59 {strides = array<i32>} : memref<8x160xf32, #tpu.memory_space<vmem>>, vector<1x32xf32>,
    %c2_i32 = arith.constant 2 : i32
    %61 = arith.addi %0, %c2_i32 : i32
    %62 = arith.index_cast %61 : i32 to index
    %c0_39 = arith.constant 0 : index
    %63 = memref.load %arg1[%62, %c0_39] : memref<8x5xi32, #tpu.memory_space<smem>>
    %64 = arith.index_cast %63 : i32 to index
    %c0_40 = arith.constant 0 : index
    %65 = vector.load %arg2[%64, %c0_40] : memref<40x32xf32, #tpu.memory_space<vmem>>, vector<1x32xf32>
    %c2_41 = arith.constant 2 : index
    %c0_42 = arith.constant 0 : index
    %66 = vector.load %arg10[%c2_41, %c0_42] : memref<8x160xf32, #tpu.memory_space<vmem>>, vector<1x32xf32>
    tpu.vector_store %arg10[%c2_41, %c0_42], %65 {strides = array<i32>} : memref<8x160xf32, #tpu.memory_space<vmem>>, vector<1x32xf32>,
    %c2_i32_43 = arith.constant 2 : i32
    %67 = arith.addi %0, %c2_i32_43 : i32
    %68 = arith.index_cast %67 : i32 to index
    %c1_44 = arith.constant 1 : index
    %69 = memref.load %arg1[%68, %c1_44] : memref<8x5xi32, #tpu.memory_space<smem>>
    %70 = arith.index_cast %69 : i32 to index
    %c0_45 = arith.constant 0 : index
    %71 = vector.load %arg2[%70, %c0_45] : memref<40x32xf32, #tpu.memory_space<vmem>>, vector<1x32xf32>
    %c2_46 = arith.constant 2 : index
    %c32_47 = arith.constant 32 : index
    %72 = vector.load %arg10[%c2_46, %c32_47] : memref<8x160xf32, #tpu.memory_space<vmem>>, vector<1x32xf32>
    tpu.vector_store %arg10[%c2_46, %c32_47], %71 {strides = array<i32>} : memref<8x160xf32, #tpu.memory_space<vmem>>, vector<1x32xf32>,
    %c2_i32_48 = arith.constant 2 : i32
    %73 = arith.addi %0, %c2_i32_48 : i32
    %74 = arith.index_cast %73 : i32 to index
    %c2_49 = arith.constant 2 : index
    %75 = memref.load %arg1[%74, %c2_49] : memref<8x5xi32, #tpu.memory_space<smem>>
    %76 = arith.index_cast %75 : i32 to index
    %c0_50 = arith.constant 0 : index
    %77 = vector.load %arg2[%76, %c0_50] : memref<40x32xf32, #tpu.memory_space<vmem>>, vector<1x32xf32>
    %c2_51 = arith.constant 2 : index
    %c64_52 = arith.constant 64 : index
    %78 = vector.load %arg10[%c2_51, %c64_52] : memref<8x160xf32, #tpu.memory_space<vmem>>, vector<1x32xf32>
    tpu.vector_store %arg10[%c2_51, %c64_52], %77 {strides = array<i32>} : memref<8x160xf32, #tpu.memory_space<vmem>>, vector<1x32xf32>,
    %c2_i32_53 = arith.constant 2 : i32
    %79 = arith.addi %0, %c2_i32_53 : i32
    %80 = arith.index_cast %79 : i32 to index
    %c3_54 = arith.constant 3 : index
    %81 = memref.load %arg1[%80, %c3_54] : memref<8x5xi32, #tpu.memory_space<smem>>
    %82 = arith.index_cast %81 : i32 to index
    %c0_55 = arith.constant 0 : index
    %83 = vector.load %arg2[%82, %c0_55] : memref<40x32xf32, #tpu.memory_space<vmem>>, vector<1x32xf32>
    %c2_56 = arith.constant 2 : index
    %c96_57 = arith.constant 96 : index
    %84 = vector.load %arg10[%c2_56, %c96_57] : memref<8x160xf32, #tpu.memory_space<vmem>>, vector<1x32xf32>
    tpu.vector_store %arg10[%c2_56, %c96_57], %83 {strides = array<i32>} : memref<8x160xf32, #tpu.memory_space<vmem>>, vector<1x32xf32>,
    %c2_i32_58 = arith.constant 2 : i32
    %85 = arith.addi %0, %c2_i32_58 : i32
    %86 = arith.index_cast %85 : i32 to index
    %c4_59 = arith.constant 4 : index
    %87 = memref.load %arg1[%86, %c4_59] : memref<8x5xi32, #tpu.memory_space<smem>>
    %88 = arith.index_cast %87 : i32 to index
    %c0_60 = arith.constant 0 : index
    %89 = vector.load %arg2[%88, %c0_60] : memref<40x32xf32, #tpu.memory_space<vmem>>, vector<1x32xf32>
    %c2_61 = arith.constant 2 : index
    %c128_62 = arith.constant 128 : index
    %90 = vector.load %arg10[%c2_61, %c128_62] : memref<8x160xf32, #tpu.memory_space<vmem>>, vector<1x32xf32>
    tpu.vector_store %arg10[%c2_61, %c128_62], %89 {strides = array<i32>} : memref<8x160xf32, #tpu.memory_space<vmem>>, vector<1x32xf32>,
    %c3_i32 = arith.constant 3 : i32
    %91 = arith.addi %0, %c3_i32 : i32
    %92 = arith.index_cast %91 : i32 to index
    %c0_63 = arith.constant 0 : index
    %93 = memref.load %arg1[%92, %c0_63] : memref<8x5xi32, #tpu.memory_space<smem>>
    %94 = arith.index_cast %93 : i32 to index
    %c0_64 = arith.constant 0 : index
    %95 = vector.load %arg2[%94, %c0_64] : memref<40x32xf32, #tpu.memory_space<vmem>>, vector<1x32xf32>
    %c3_65 = arith.constant 3 : index
    %c0_66 = arith.constant 0 : index
    %96 = vector.load %arg10[%c3_65, %c0_66] : memref<8x160xf32, #tpu.memory_space<vmem>>, vector<1x32xf32>
    tpu.vector_store %arg10[%c3_65, %c0_66], %95 {strides = array<i32>} : memref<8x160xf32, #tpu.memory_space<vmem>>, vector<1x32xf32>,
    %c3_i32_67 = arith.constant 3 : i32
    %97 = arith.addi %0, %c3_i32_67 : i32
    %98 = arith.index_cast %97 : i32 to index
    %c1_68 = arith.constant 1 : index
    %99 = memref.load %arg1[%98, %c1_68] : memref<8x5xi32, #tpu.memory_space<smem>>
    %100 = arith.index_cast %99 : i32 to index
    %c0_69 = arith.constant 0 : index
    %101 = vector.load %arg2[%100, %c0_69] : memref<40x32xf32, #tpu.memory_space<vmem>>, vector<1x32xf32>
    %c3_70 = arith.constant 3 : index
    %c32_71 = arith.constant 32 : index
    %102 = vector.load %arg10[%c3_70, %c32_71] : memref<8x160xf32, #tpu.memory_space<vmem>>, vector<1x32xf32>
    tpu.vector_store %arg10[%c3_70, %c32_71], %101 {strides = array<i32>} : memref<8x160xf32, #tpu.memory_space<vmem>>, vector<1x32xf32>,
    %c3_i32_72 = arith.constant 3 : i32
    %103 = arith.addi %0, %c3_i32_72 : i32
    %104 = arith.index_cast %103 : i32 to index
    %c2_73 = arith.constant 2 : index
    %105 = memref.load %arg1[%104, %c2_73] : memref<8x5xi32, #tpu.memory_space<smem>>
    %106 = arith.index_cast %105 : i32 to index
    %c0_74 = arith.constant 0 : index
    %107 = vector.load %arg2[%106, %c0_74] : memref<40x32xf32, #tpu.memory_space<vmem>>, vector<1x32xf32>
    %c3_75 = arith.constant 3 : index
    %c64_76 = arith.constant 64 : index
    %108 = vector.load %arg10[%c3_75, %c64_76] : memref<8x160xf32, #tpu.memory_space<vmem>>, vector<1x32xf32>
    tpu.vector_store %arg10[%c3_75, %c64_76], %107 {strides = array<i32>} : memref<8x160xf32, #tpu.memory_space<vmem>>, vector<1x32xf32>,
    %c3_i32_77 = arith.constant 3 : i32
    %109 = arith.addi %0, %c3_i32_77 : i32
    %110 = arith.index_cast %109 : i32 to index
    %c3_78 = arith.constant 3 : index
    %111 = memref.load %arg1[%110, %c3_78] : memref<8x5xi32, #tpu.memory_space<smem>>
    %112 = arith.index_cast %111 : i32 to index
    %c0_79 = arith.constant 0 : index
    %113 = vector.load %arg2[%112, %c0_79] : memref<40x32xf32, #tpu.memory_space<vmem>>, vector<1x32xf32>
    %c3_80 = arith.constant 3 : index
    %c96_81 = arith.constant 96 : index
    %114 = vector.load %arg10[%c3_80, %c96_81] : memref<8x160xf32, #tpu.memory_space<vmem>>, vector<1x32xf32>
    tpu.vector_store %arg10[%c3_80, %c96_81], %113 {strides = array<i32>} : memref<8x160xf32, #tpu.memory_space<vmem>>, vector<1x32xf32>,
    %c3_i32_82 = arith.constant 3 : i32
    %115 = arith.addi %0, %c3_i32_82 : i32
    %116 = arith.index_cast %115 : i32 to index
    %c4_83 = arith.constant 4 : index
    %117 = memref.load %arg1[%116, %c4_83] : memref<8x5xi32, #tpu.memory_space<smem>>
    %118 = arith.index_cast %117 : i32 to index
    %c0_84 = arith.constant 0 : index
    %119 = vector.load %arg2[%118, %c0_84] : memref<40x32xf32, #tpu.memory_space<vmem>>, vector<1x32xf32>
    %c3_85 = arith.constant 3 : index
    %c128_86 = arith.constant 128 : index
    %120 = vector.load %arg10[%c3_85, %c128_86] : memref<8x160xf32, #tpu.memory_space<vmem>>, vector<1x32xf32>
    tpu.vector_store %arg10[%c3_85, %c128_86], %119 {strides = array<i32>} : memref<8x160xf32, #tpu.memory_space<vmem>>, vector<1x32xf32>,
    %c4_i32 = arith.constant 4 : i32
    %121 = arith.addi %0, %c4_i32 : i32
    %122 = arith.index_cast %121 : i32 to index
    %c0_87 = arith.constant 0 : index
    %123 = memref.load %arg1[%122, %c0_87] : memref<8x5xi32, #tpu.memory_space<smem>>
    %124 = arith.index_cast %123 : i32 to index
    %c0_88 = arith.constant 0 : index
    %125 = vector.load %arg2[%124, %c0_88] : memref<40x32xf32, #tpu.memory_space<vmem>>, vector<1x32xf32>
    %c4_89 = arith.constant 4 : index
    %c0_90 = arith.constant 0 : index
    %126 = vector.load %arg10[%c4_89, %c0_90] : memref<8x160xf32, #tpu.memory_space<vmem>>, vector<1x32xf32>
    tpu.vector_store %arg10[%c4_89, %c0_90], %125 {strides = array<i32>} : memref<8x160xf32, #tpu.memory_space<vmem>>, vector<1x32xf32>,
    %c4_i32_91 = arith.constant 4 : i32
    %127 = arith.addi %0, %c4_i32_91 : i32
    %128 = arith.index_cast %127 : i32 to index
    %c1_92 = arith.constant 1 : index
    %129 = memref.load %arg1[%128, %c1_92] : memref<8x5xi32, #tpu.memory_space<smem>>
    %130 = arith.index_cast %129 : i32 to index
    %c0_93 = arith.constant 0 : index
    %131 = vector.load %arg2[%130, %c0_93] : memref<40x32xf32, #tpu.memory_space<vmem>>, vector<1x32xf32>
    %c4_94 = arith.constant 4 : index
    %c32_95 = arith.constant 32 : index
    %132 = vector.load %arg10[%c4_94, %c32_95] : memref<8x160xf32, #tpu.memory_space<vmem>>, vector<1x32xf32>
    tpu.vector_store %arg10[%c4_94, %c32_95], %131 {strides = array<i32>} : memref<8x160xf32, #tpu.memory_space<vmem>>, vector<1x32xf32>,
    %c4_i32_96 = arith.constant 4 : i32
    %133 = arith.addi %0, %c4_i32_96 : i32
    %134 = arith.index_cast %133 : i32 to index
    %c2_97 = arith.constant 2 : index
    %135 = memref.load %arg1[%134, %c2_97] : memref<8x5xi32, #tpu.memory_space<smem>>
    %136 = arith.index_cast %135 : i32 to index
    %c0_98 = arith.constant 0 : index
    %137 = vector.load %arg2[%136, %c0_98] : memref<40x32xf32, #tpu.memory_space<vmem>>, vector<1x32xf32>
    %c4_99 = arith.constant 4 : index
    %c64_100 = arith.constant 64 : index
    %138 = vector.load %arg10[%c4_99, %c64_100] : memref<8x160xf32, #tpu.memory_space<vmem>>, vector<1x32xf32>
    tpu.vector_store %arg10[%c4_99, %c64_100], %137 {strides = array<i32>} : memref<8x160xf32, #tpu.memory_space<vmem>>, vector<1x32xf32>,
    %c4_i32_101 = arith.constant 4 : i32
    %139 = arith.addi %0, %c4_i32_101 : i32
    %140 = arith.index_cast %139 : i32 to index
    %c3_102 = arith.constant 3 : index
    %141 = memref.load %arg1[%140, %c3_102] : memref<8x5xi32, #tpu.memory_space<smem>>
    %142 = arith.index_cast %141 : i32 to index
    %c0_103 = arith.constant 0 : index
    %143 = vector.load %arg2[%142, %c0_103] : memref<40x32xf32, #tpu.memory_space<vmem>>, vector<1x32xf32>
    %c4_104 = arith.constant 4 : index
    %c96_105 = arith.constant 96 : index
    %144 = vector.load %arg10[%c4_104, %c96_105] : memref<8x160xf32, #tpu.memory_space<vmem>>, vector<1x32xf32>
    tpu.vector_store %arg10[%c4_104, %c96_105], %143 {strides = array<i32>} : memref<8x160xf32, #tpu.memory_space<vmem>>, vector<1x32xf32>,
    %c4_i32_106 = arith.constant 4 : i32
    %145 = arith.addi %0, %c4_i32_106 : i32
    %146 = arith.index_cast %145 : i32 to index
    %c4_107 = arith.constant 4 : index
    %147 = memref.load %arg1[%146, %c4_107] : memref<8x5xi32, #tpu.memory_space<smem>>
    %148 = arith.index_cast %147 : i32 to index
    %c0_108 = arith.constant 0 : index
    %149 = vector.load %arg2[%148, %c0_108] : memref<40x32xf32, #tpu.memory_space<vmem>>, vector<1x32xf32>
    %c4_109 = arith.constant 4 : index
    %c128_110 = arith.constant 128 : index
    %150 = vector.load %arg10[%c4_109, %c128_110] : memref<8x160xf32, #tpu.memory_space<vmem>>, vector<1x32xf32>
    tpu.vector_store %arg10[%c4_109, %c128_110], %149 {strides = array<i32>} : memref<8x160xf32, #tpu.memory_space<vmem>>, vector<1x32xf32>,
    %c5_i32 = arith.constant 5 : i32
    %151 = arith.addi %0, %c5_i32 : i32
    %152 = arith.index_cast %151 : i32 to index
    %c0_111 = arith.constant 0 : index
    %153 = memref.load %arg1[%152, %c0_111] : memref<8x5xi32, #tpu.memory_space<smem>>
    %154 = arith.index_cast %153 : i32 to index
    %c0_112 = arith.constant 0 : index
    %155 = vector.load %arg2[%154, %c0_112] : memref<40x32xf32, #tpu.memory_space<vmem>>, vector<1x32xf32>
    %c5 = arith.constant 5 : index
    %c0_113 = arith.constant 0 : index
    %156 = vector.load %arg10[%c5, %c0_113] : memref<8x160xf32, #tpu.memory_space<vmem>>, vector<1x32xf32>
    tpu.vector_store %arg10[%c5, %c0_113], %155 {strides = array<i32>} : memref<8x160xf32, #tpu.memory_space<vmem>>, vector<1x32xf32>,
    %c5_i32_114 = arith.constant 5 : i32
    %157 = arith.addi %0, %c5_i32_114 : i32
    %158 = arith.index_cast %157 : i32 to index
    %c1_115 = arith.constant 1 : index
    %159 = memref.load %arg1[%158, %c1_115] : memref<8x5xi32, #tpu.memory_space<smem>>
    %160 = arith.index_cast %159 : i32 to index
    %c0_116 = arith.constant 0 : index
    %161 = vector.load %arg2[%160, %c0_116] : memref<40x32xf32, #tpu.memory_space<vmem>>, vector<1x32xf32>
    %c5_117 = arith.constant 5 : index
    %c32_118 = arith.constant 32 : index
    %162 = vector.load %arg10[%c5_117, %c32_118] : memref<8x160xf32, #tpu.memory_space<vmem>>, vector<1x32xf32>
    tpu.vector_store %arg10[%c5_117, %c32_118], %161 {strides = array<i32>} : memref<8x160xf32, #tpu.memory_space<vmem>>, vector<1x32xf32>,
    %c5_i32_119 = arith.constant 5 : i32
    %163 = arith.addi %0, %c5_i32_119 : i32
    %164 = arith.index_cast %163 : i32 to index
    %c2_120 = arith.constant 2 : index
    %165 = memref.load %arg1[%164, %c2_120] : memref<8x5xi32, #tpu.memory_space<smem>>
    %166 = arith.index_cast %165 : i32 to index
    %c0_121 = arith.constant 0 : index
    %167 = vector.load %arg2[%166, %c0_121] : memref<40x32xf32, #tpu.memory_space<vmem>>, vector<1x32xf32>
    %c5_122 = arith.constant 5 : index
    %c64_123 = arith.constant 64 : index
    %168 = vector.load %arg10[%c5_122, %c64_123] : memref<8x160xf32, #tpu.memory_space<vmem>>, vector<1x32xf32>
    tpu.vector_store %arg10[%c5_122, %c64_123], %167 {strides = array<i32>} : memref<8x160xf32, #tpu.memory_space<vmem>>, vector<1x32xf32>,
    %c5_i32_124 = arith.constant 5 : i32
    %169 = arith.addi %0, %c5_i32_124 : i32
    %170 = arith.index_cast %169 : i32 to index
    %c3_125 = arith.constant 3 : index
    %171 = memref.load %arg1[%170, %c3_125] : memref<8x5xi32, #tpu.memory_space<smem>>
    %172 = arith.index_cast %171 : i32 to index
    %c0_126 = arith.constant 0 : index
    %173 = vector.load %arg2[%172, %c0_126] : memref<40x32xf32, #tpu.memory_space<vmem>>, vector<1x32xf32>
    %c5_127 = arith.constant 5 : index
    %c96_128 = arith.constant 96 : index
    %174 = vector.load %arg10[%c5_127, %c96_128] : memref<8x160xf32, #tpu.memory_space<vmem>>, vector<1x32xf32>
    tpu.vector_store %arg10[%c5_127, %c96_128], %173 {strides = array<i32>} : memref<8x160xf32, #tpu.memory_space<vmem>>, vector<1x32xf32>,
    %c5_i32_129 = arith.constant 5 : i32
    %175 = arith.addi %0, %c5_i32_129 : i32
    %176 = arith.index_cast %175 : i32 to index
    %c4_130 = arith.constant 4 : index
    %177 = memref.load %arg1[%176, %c4_130] : memref<8x5xi32, #tpu.memory_space<smem>>
    %178 = arith.index_cast %177 : i32 to index
    %c0_131 = arith.constant 0 : index
    %179 = vector.load %arg2[%178, %c0_131] : memref<40x32xf32, #tpu.memory_space<vmem>>, vector<1x32xf32>
    %c5_132 = arith.constant 5 : index
    %c128_133 = arith.constant 128 : index
    %180 = vector.load %arg10[%c5_132, %c128_133] : memref<8x160xf32, #tpu.memory_space<vmem>>, vector<1x32xf32>
    tpu.vector_store %arg10[%c5_132, %c128_133], %179 {strides = array<i32>} : memref<8x160xf32, #tpu.memory_space<vmem>>, vector<1x32xf32>,
    %c6_i32 = arith.constant 6 : i32
    %181 = arith.addi %0, %c6_i32 : i32
    %182 = arith.index_cast %181 : i32 to index
    %c0_134 = arith.constant 0 : index
    %183 = memref.load %arg1[%182, %c0_134] : memref<8x5xi32, #tpu.memory_space<smem>>
    %184 = arith.index_cast %183 : i32 to index
    %c0_135 = arith.constant 0 : index
    %185 = vector.load %arg2[%184, %c0_135] : memref<40x32xf32, #tpu.memory_space<vmem>>, vector<1x32xf32>
    %c6 = arith.constant 6 : index
    %c0_136 = arith.constant 0 : index
    %186 = vector.load %arg10[%c6, %c0_136] : memref<8x160xf32, #tpu.memory_space<vmem>>, vector<1x32xf32>
    tpu.vector_store %arg10[%c6, %c0_136], %185 {strides = array<i32>} : memref<8x160xf32, #tpu.memory_space<vmem>>, vector<1x32xf32>,
    %c6_i32_137 = arith.constant 6 : i32
    %187 = arith.addi %0, %c6_i32_137 : i32
    %188 = arith.index_cast %187 : i32 to index
    %c1_138 = arith.constant 1 : index
    %189 = memref.load %arg1[%188, %c1_138] : memref<8x5xi32, #tpu.memory_space<smem>>
    %190 = arith.index_cast %189 : i32 to index
    %c0_139 = arith.constant 0 : index
    %191 = vector.load %arg2[%190, %c0_139] : memref<40x32xf32, #tpu.memory_space<vmem>>, vector<1x32xf32>
    %c6_140 = arith.constant 6 : index
    %c32_141 = arith.constant 32 : index
    %192 = vector.load %arg10[%c6_140, %c32_141] : memref<8x160xf32, #tpu.memory_space<vmem>>, vector<1x32xf32>
    tpu.vector_store %arg10[%c6_140, %c32_141], %191 {strides = array<i32>} : memref<8x160xf32, #tpu.memory_space<vmem>>, vector<1x32xf32>,
    %c6_i32_142 = arith.constant 6 : i32
    %193 = arith.addi %0, %c6_i32_142 : i32
    %194 = arith.index_cast %193 : i32 to index
    %c2_143 = arith.constant 2 : index
    %195 = memref.load %arg1[%194, %c2_143] : memref<8x5xi32, #tpu.memory_space<smem>>
    %196 = arith.index_cast %195 : i32 to index
    %c0_144 = arith.constant 0 : index
    %197 = vector.load %arg2[%196, %c0_144] : memref<40x32xf32, #tpu.memory_space<vmem>>, vector<1x32xf32>
    %c6_145 = arith.constant 6 : index
    %c64_146 = arith.constant 64 : index
    %198 = vector.load %arg10[%c6_145, %c64_146] : memref<8x160xf32, #tpu.memory_space<vmem>>, vector<1x32xf32>
    tpu.vector_store %arg10[%c6_145, %c64_146], %197 {strides = array<i32>} : memref<8x160xf32, #tpu.memory_space<vmem>>, vector<1x32xf32>,
    %c6_i32_147 = arith.constant 6 : i32
    %199 = arith.addi %0, %c6_i32_147 : i32
    %200 = arith.index_cast %199 : i32 to index
    %c3_148 = arith.constant 3 : index
    %201 = memref.load %arg1[%200, %c3_148] : memref<8x5xi32, #tpu.memory_space<smem>>
    %202 = arith.index_cast %201 : i32 to index
    %c0_149 = arith.constant 0 : index
    %203 = vector.load %arg2[%202, %c0_149] : memref<40x32xf32, #tpu.memory_space<vmem>>, vector<1x32xf32>
    %c6_150 = arith.constant 6 : index
    %c96_151 = arith.constant 96 : index
    %204 = vector.load %arg10[%c6_150, %c96_151] : memref<8x160xf32, #tpu.memory_space<vmem>>, vector<1x32xf32>
    tpu.vector_store %arg10[%c6_150, %c96_151], %203 {strides = array<i32>} : memref<8x160xf32, #tpu.memory_space<vmem>>, vector<1x32xf32>,
    %c6_i32_152 = arith.constant 6 : i32
    %205 = arith.addi %0, %c6_i32_152 : i32
    %206 = arith.index_cast %205 : i32 to index
    %c4_153 = arith.constant 4 : index
    %207 = memref.load %arg1[%206, %c4_153] : memref<8x5xi32, #tpu.memory_space<smem>>
    %208 = arith.index_cast %207 : i32 to index
    %c0_154 = arith.constant 0 : index
    %209 = vector.load %arg2[%208, %c0_154] : memref<40x32xf32, #tpu.memory_space<vmem>>, vector<1x32xf32>
    %c6_155 = arith.constant 6 : index
    %c128_156 = arith.constant 128 : index
    %210 = vector.load %arg10[%c6_155, %c128_156] : memref<8x160xf32, #tpu.memory_space<vmem>>, vector<1x32xf32>
    tpu.vector_store %arg10[%c6_155, %c128_156], %209 {strides = array<i32>} : memref<8x160xf32, #tpu.memory_space<vmem>>, vector<1x32xf32>,
    %c7_i32 = arith.constant 7 : i32
    %211 = arith.addi %0, %c7_i32 : i32
    %212 = arith.index_cast %211 : i32 to index
    %c0_157 = arith.constant 0 : index
    %213 = memref.load %arg1[%212, %c0_157] : memref<8x5xi32, #tpu.memory_space<smem>>
    %214 = arith.index_cast %213 : i32 to index
    %c0_158 = arith.constant 0 : index
    %215 = vector.load %arg2[%214, %c0_158] : memref<40x32xf32, #tpu.memory_space<vmem>>, vector<1x32xf32>
    %c7 = arith.constant 7 : index
    %c0_159 = arith.constant 0 : index
    %216 = vector.load %arg10[%c7, %c0_159] : memref<8x160xf32, #tpu.memory_space<vmem>>, vector<1x32xf32>
    tpu.vector_store %arg10[%c7, %c0_159], %215 {strides = array<i32>} : memref<8x160xf32, #tpu.memory_space<vmem>>, vector<1x32xf32>,
    %c7_i32_160 = arith.constant 7 : i32
    %217 = arith.addi %0, %c7_i32_160 : i32
    %218 = arith.index_cast %217 : i32 to index
    %c1_161 = arith.constant 1 : index
    %219 = memref.load %arg1[%218, %c1_161] : memref<8x5xi32, #tpu.memory_space<smem>>
    %220 = arith.index_cast %219 : i32 to index
    %c0_162 = arith.constant 0 : index
    %221 = vector.load %arg2[%220, %c0_162] : memref<40x32xf32, #tpu.memory_space<vmem>>, vector<1x32xf32>
    %c7_163 = arith.constant 7 : index
    %c32_164 = arith.constant 32 : index
    %222 = vector.load %arg10[%c7_163, %c32_164] : memref<8x160xf32, #tpu.memory_space<vmem>>, vector<1x32xf32>
    tpu.vector_store %arg10[%c7_163, %c32_164], %221 {strides = array<i32>} : memref<8x160xf32, #tpu.memory_space<vmem>>, vector<1x32xf32>,
    %c7_i32_165 = arith.constant 7 : i32
    %223 = arith.addi %0, %c7_i32_165 : i32
    %224 = arith.index_cast %223 : i32 to index
    %c2_166 = arith.constant 2 : index
    %225 = memref.load %arg1[%224, %c2_166] : memref<8x5xi32, #tpu.memory_space<smem>>
    %226 = arith.index_cast %225 : i32 to index
    %c0_167 = arith.constant 0 : index
    %227 = vector.load %arg2[%226, %c0_167] : memref<40x32xf32, #tpu.memory_space<vmem>>, vector<1x32xf32>
    %c7_168 = arith.constant 7 : index
    %c64_169 = arith.constant 64 : index
    %228 = vector.load %arg10[%c7_168, %c64_169] : memref<8x160xf32, #tpu.memory_space<vmem>>, vector<1x32xf32>
    tpu.vector_store %arg10[%c7_168, %c64_169], %227 {strides = array<i32>} : memref<8x160xf32, #tpu.memory_space<vmem>>, vector<1x32xf32>,
    %c7_i32_170 = arith.constant 7 : i32
    %229 = arith.addi %0, %c7_i32_170 : i32
    %230 = arith.index_cast %229 : i32 to index
    %c3_171 = arith.constant 3 : index
    %231 = memref.load %arg1[%230, %c3_171] : memref<8x5xi32, #tpu.memory_space<smem>>
    %232 = arith.index_cast %231 : i32 to index
    %c0_172 = arith.constant 0 : index
    %233 = vector.load %arg2[%232, %c0_172] : memref<40x32xf32, #tpu.memory_space<vmem>>, vector<1x32xf32>
    %c7_173 = arith.constant 7 : index
    %c96_174 = arith.constant 96 : index
    %234 = vector.load %arg10[%c7_173, %c96_174] : memref<8x160xf32, #tpu.memory_space<vmem>>, vector<1x32xf32>
    tpu.vector_store %arg10[%c7_173, %c96_174], %233 {strides = array<i32>} : memref<8x160xf32, #tpu.memory_space<vmem>>, vector<1x32xf32>,
    %c7_i32_175 = arith.constant 7 : i32
    %235 = arith.addi %0, %c7_i32_175 : i32
    %236 = arith.index_cast %235 : i32 to index
    %c4_176 = arith.constant 4 : index
    %237 = memref.load %arg1[%236, %c4_176] : memref<8x5xi32, #tpu.memory_space<smem>>
    %238 = arith.index_cast %237 : i32 to index
    %c0_177 = arith.constant 0 : index
    %239 = vector.load %arg2[%238, %c0_177] : memref<40x32xf32, #tpu.memory_space<vmem>>, vector<1x32xf32>
    %c7_178 = arith.constant 7 : index
    %c128_179 = arith.constant 128 : index
    %240 = vector.load %arg10[%c7_178, %c128_179] : memref<8x160xf32, #tpu.memory_space<vmem>>, vector<1x32xf32>
    tpu.vector_store %arg10[%c7_178, %c128_179], %239 {strides = array<i32>} : memref<8x160xf32, #tpu.memory_space<vmem>>, vector<1x32xf32>,
    %c0_180 = arith.constant 0 : index
    %c0_181 = arith.constant 0 : index
    %241 = vector.load %arg10[%c0_180, %c0_181] : memref<8x160xf32, #tpu.memory_space<vmem>>, vector<8x160xf32>
    %242 = arith.truncf %241 : vector<8x160xf32> to vector<8x160xbf16>
    %c0_182 = arith.constant 0 : index
    %c0_183 = arith.constant 0 : index
    %243 = vector.load %arg3[%c0_182, %c0_183] : memref<160x128xbf16, #tpu.memory_space<vmem>>, vector<160x128xbf16>
    %cst = arith.constant dense<0.000000e+00> : vector<8x128xf32>
    %244 = tpu.matmul %242, %243, %cst {dimension_numbers = #tpu.dot_dimension_numbers<[1], [0], [0], [1], [0, 0, 1, 1], [], []>} : vector<8x160xbf16>, vector<160x128xbf16>, vector<8x128xf32> -> vector<8x128xf32>
    %c0_184 = arith.constant 0 : index
    %c0_185 = arith.constant 0 : index
    %245 = vector.load %arg4[%c0_184, %c0_185] : memref<1x128xf32, #tpu.memory_space<vmem>>, vector<1x128xf32>
    %246 = vector.broadcast %245 : vector<1x128xf32> to vector<8x128xf32>
    %247 = arith.addf %244, %246 : vector<8x128xf32>
    %cst_186 = arith.constant 0.000000e+00 : f32
    %248 = vector.broadcast %cst_186 : f32 to vector<8x128xf32>
    %249 = arith.maximumf %247, %248 : vector<8x128xf32>
    %250 = arith.truncf %249 : vector<8x128xf32> to vector<8x128xbf16>
    %c0_187 = arith.constant 0 : index
    %c0_188 = arith.constant 0 : index
    %251 = vector.load %arg5[%c0_187, %c0_188] : memref<128x128xbf16, #tpu.memory_space<vmem>>, vector<128x128xbf16>
    %cst_189 = arith.constant dense<0.000000e+00> : vector<8x128xf32>
    %252 = tpu.matmul %250, %251, %cst_189 {dimension_numbers = #tpu.dot_dimension_numbers<[1], [0], [0], [1], [0, 0, 1, 1], [], []>} : vector<8x128xbf16>, vector<128x128xbf16>, vector<8x128xf32> -> vector<8x128xf32>
    %c0_190 = arith.constant 0 : index
    %c0_191 = arith.constant 0 : index
    %253 = vector.load %arg6[%c0_190, %c0_191] : memref<1x128xf32, #tpu.memory_space<vmem>>, vector<1x128xf32>
    %254 = vector.broadcast %253 : vector<1x128xf32> to vector<8x128xf32>
    %255 = arith.addf %252, %254 : vector<8x128xf32>
    %cst_192 = arith.constant 0.000000e+00 : f32
    %256 = vector.broadcast %cst_192 : f32 to vector<8x128xf32>
    %257 = arith.maximumf %255, %256 : vector<8x128xf32>
    %258 = arith.truncf %257 : vector<8x128xf32> to vector<8x128xbf16>
    %c0_193 = arith.constant 0 : index
    %c0_194 = arith.constant 0 : index
    %259 = vector.load %arg7[%c0_193, %c0_194] : memref<128x128xbf16, #tpu.memory_space<vmem>>, vector<128x128xbf16>
    %cst_195 = arith.constant dense<0.000000e+00> : vector<8x128xf32>
    %260 = tpu.matmul %258, %259, %cst_195 {dimension_numbers = #tpu.dot_dimension_numbers<[1], [0], [0], [1], [0, 0, 1, 1], [], []>} : vector<8x128xbf16>, vector<128x128xbf16>, vector<8x128xf32> -> vector<8x128xf32>
    %c0_196 = arith.constant 0 : index
    %c0_197 = arith.constant 0 : index
    %261 = vector.load %arg8[%c0_196, %c0_197] : memref<1x128xf32, #tpu.memory_space<vmem>>, vector<1x128xf32>
    %262 = vector.broadcast %261 : vector<1x128xf32> to vector<8x128xf32>
    %263 = arith.addf %260, %262 : vector<8x128xf32>
    %c0_198 = arith.constant 0 : index
    %c0_199 = arith.constant 0 : index
    %264 = vector.load %arg9[%c0_198, %c0_199] : memref<8x128xf32, #tpu.memory_space<vmem>>, vector<8x128xf32>
    tpu.vector_store %arg9[%c0_198, %c0_199], %263 {strides = array<i32>} : memref<8x128xf32, #tpu.memory_space<vmem>>, vector<8x128xf32>,
    return
  }
  func.func @transform_0(%arg0: i32, %arg1: memref<8x5xi32, #tpu.memory_space<smem>>) -> (i32, i32) {
    %c0_i32 = arith.constant 0 : i32
    %c0_i32_0 = arith.constant 0 : i32
    %c0_i32_1 = arith.constant 0 : i32
    return %c0_i32, %c0_i32_0 : i32, i32
  }
  func.func @transform_1(%arg0: i32, %arg1: memref<8x5xi32, #tpu.memory_space<smem>>) -> (i32, i32) {
    %c0_i32 = arith.constant 0 : i32
    %c0_i32_0 = arith.constant 0 : i32
    %c0_i32_1 = arith.constant 0 : i32
    return %c0_i32, %c0_i32_0 : i32, i32
  }
  func.func @transform_2(%arg0: i32, %arg1: memref<8x5xi32, #tpu.memory_space<smem>>) -> (i32, i32) {
    %c0_i32 = arith.constant 0 : i32
    %c0_i32_0 = arith.constant 0 : i32
    %c0_i32_1 = arith.constant 0 : i32
    return %c0_i32, %c0_i32_0 : i32, i32
  }
  func.func @transform_3(%arg0: i32, %arg1: memref<8x5xi32, #tpu.memory_space<smem>>) -> (i32, i32) {
    %c0_i32 = arith.constant 0 : i32
    %c0_i32_0 = arith.constant 0 : i32
    %c0_i32_1 = arith.constant 0 : i32
    return %c0_i32, %c0_i32_0 : i32, i32
  }
  func.func @transform_4(%arg0: i32, %arg1: memref<8x5xi32, #tpu.memory_space<smem>>) -> (i32, i32) {
    %c0_i32 = arith.constant 0 : i32
    %c0_i32_0 = arith.constant 0 : i32
    %c0_i32_1 = arith.constant 0 : i32
    return %c0_i32, %c0_i32_0 : i32, i32
  }
  func.func @transform_5(%arg0: i32, %arg1: memref<8x5xi32, #tpu.memory_space<smem>>) -> (i32, i32) {
    %c0_i32 = arith.constant 0 : i32
    %c0_i32_0 = arith.constant 0 : i32
    %c0_i32_1 = arith.constant 0 : i32
    return %c0_i32, %c0_i32_0 : i32, i32
  }
  func.func @transform_6(%arg0: i32, %arg1: memref<8x5xi32, #tpu.memory_space<smem>>) -> (i32, i32) {
    %c0_i32 = arith.constant 0 : i32
    %c0_i32_0 = arith.constant 0 : i32
    %c0_i32_1 = arith.constant 0 : i32
    return %c0_i32, %c0_i32_0 : i32, i32
  }
  func.func @transform_7(%arg0: i32, %arg1: memref<8x5xi32, #tpu.memory_space<smem>>) -> (i32, i32) {
    %c0_i32 = arith.constant 0 : i32
    %c0_i32_0 = arith.constant 0 : i32
    return %arg0, %c0_i32 : i32, i32
  }
}

</mosaic_0001>

<bundles_post_ra>
// kernel: tpu_custom_call.1
= control target key start
LH: loop header
LB: loop body
LE: loop exit
PB: predicated region body
PF: predicated region fallthrough
CT: control target
= control target key end

     0   :  { %s1500_s0 = inlined_call_operand.vmem [shape: s32[8,5], index: 0, kind: input, shape index: {}]   ;;  %s1501_s1 = inlined_call_operand.vmem [shape: f32[40,32], index: 1, kind: input, shape index: {}]   ;;  %s1502_s2 = inlined_call_operand.hbm [shape: bf16[160,128], index: 2, kind: input, shape index: {}]   ;;  %s1503_s3 = inlined_call_operand.vmem [shape: f32[1,128], index: 3, kind: input, shape index: {}]   ;;  %s1504_s4 = inlined_call_operand.vmem [shape: bf16[128,128], index: 4, kind: input, shape index: {}]   ;;  %s1505_s5 = inlined_call_operand.vmem [shape: f32[1,128], index: 5, kind: input, shape index: {}]   ;;  %s1506_s6 = inlined_call_operand.hbm [shape: bf16[128,128], index: 6, kind: input, shape index: {}]   ;;  %s1507_s7 = inlined_call_operand.vmem [shape: f32[1,128], index: 7, kind: input, shape index: {}]   ;;  %s1508_s8 = inlined_call_operand.hbm [shape: f32[8,128], index: 8, kind: output, shape index: {}]  }
   0x1   :  { %1513 = sst [smem:[#allocation16_spill]] %s1503_s3  ;;  %s13_s29 = sshll.u32 %s1500_s0, 4  ;;  %s14_s29 = int_to_ptr.vmem [resolvable:$true] %s13_s29 }
   0x2   :  { %1514 = sst [smem:[#allocation17_spill]] %s1504_s4  ;;  %s953_s30 = scalar_lea.vmem %s14_s29, 128 }
   0x3   :  { %1515 = sst [smem:[#allocation18_spill]] %s1505_s5  ;;  %p954_p0 = scmp.ne.s32.totalorder %s14_s29, %s953_s30 }
   0x4   :  { %1516 = sst [smem:[#allocation19_spill]] %s1507_s7  ;;  %p958_p1 = scmp.lt.s32.totalorder %s14_s29, %s14_s29 }
   0x5   :  { %1517 = sst [smem:[#allocation20_spill]] %s1508_s8  ;;  %p959_p2 = scmp.lt.s32.totalorder %s953_s30, %s953_s30 }
   0x7   :  { %p960_p3 = por %p959_p2, %p958_p1 }
   0x9   :  { %p961_p4 = pnand %p960_p3, %p954_p0 }
   0xb   :  { %964 = shalt.err (!%p961_p4)  }
   0xc   :  { %s1039_s9 = smov [#allocation4]  }
   0xd   :  { %16 = dma.vmem_to_smem %s14_s29, 128, %s1039_s9, [#allocation3] }
   0xe   :  { %1031 = dma.done.wait [#allocation3], 128 }
   0xf   :  { %1032 = vsyncadd [#allocation3], 4294967168 }
  0x10   :  { %18 = sfence }
  0x11   :  { %19 = vsyncpa [#allocation6], 0 }
  0x12   :  { %20 = vsyncpa [#allocation9], 0 }
  0x13   :  { %21 = vsyncpa [#allocation7], 0  ;;  %s1040_s10 = smov [#allocation5]   ;;  %s965_s13 = scalar_lea.hbm %s1502_s2, 1280 }
  0x14   :  { %s29_s11 = sshll.u32 %s1040_s10, 4  ;;  %p966_p5 = scmp.ne.s32.totalorder %s1502_s2, %s965_s13  ;;  %s30_s11 = int_to_ptr.vmem [resolvable:$true] %s29_s11 }
  0x15   :  { %p969_p6 = scmp.lt.u32.totalorder %s965_s13, %s1502_s2 }
  0x17   :  { %p971_p7 = pnand %p969_p6, %p966_p5 }
  0x19   :  { %974 = shalt.err (!%p971_p7)
}
  0x1a   :  { %s975_s18 = scalar_lea.vmem %s30_s11, 1280  ;;  %p980_p9 = scmp.lt.s32.totalorder %s30_s11, %s30_s11 }
  0x1b   :  { %p976_p8 = scmp.ne.s32.totalorder %s30_s11, %s975_s18  ;;  %p981_p10 = scmp.lt.s32.totalorder %s975_s18, %s975_s18 }
  0x1d   :  { %p982_p11 = por %p981_p10, %p980_p9 }
  0x1f   :  { %p983_p12 = pnand %p982_p11, %p976_p8 }
  0x21   :  { %986 = shalt.err (!%p983_p12)
}
  0x22   :  { %s1511_s19 = smov 64   ;;  %s1042_s20 = smov 4  }
  0x23   :  { %35 = dma.hbm_to_vmem [thread:$0]  %s1502_s2, 1280, %s30_s11, [#allocation6], %s1511_s19, %s1511_s19, %s1042_s20  }
  0x24   :  { %s1043_s23 = smov [#allocation8]   ;;  %s987_s27 = scalar_lea.hbm %s1506_s6, 1024 }
  0x25   :  { %s47_s24 = sshll.u32 %s1043_s23, 4  ;;  %p988_p13 = scmp.ne.s32.totalorder %s1506_s6, %s987_s27  ;;  %s48_s24 = int_to_ptr.vmem [resolvable:$true] %s47_s24 }
  0x26   :  { %p991_p0 = scmp.lt.u32.totalorder %s987_s27, %s1506_s6 }
  0x28   :  { %p993_p1 = pnand %p991_p0, %p988_p13 }
  0x2a   :  { %996 = shalt.err (!%p993_p1)
}
  0x2b   :  { %s997_s10 = scalar_lea.vmem %s48_s24, 1024  ;;  %p1002_p3 = scmp.lt.s32.totalorder %s48_s24, %s48_s24 }
  0x2c   :  { %p998_p2 = scmp.ne.s32.totalorder %s48_s24, %s997_s10  ;;  %p1003_p4 = scmp.lt.s32.totalorder %s997_s10, %s997_s10 }
  0x2e   :  { %p1004_p5 = por %p1003_p4, %p1002_p3 }
  0x30   :  { %p1005_p6 = pnand %p1004_p5, %p998_p2 }
  0x32   :  { %1008 = shalt.err (!%p1005_p6)
}
  0x33   :  { %53 = dma.hbm_to_vmem [thread:$0]  %s1506_s6, 1024, %s48_s24, [#allocation9], %s1511_s19, %s1511_s19, %s1042_s20  }
  0x34   :  { %1033 = dma.done.wait [#allocation6], 1280  }
  0x35   :  { %1034 = vsyncadd [#allocation6], 4294966016 }
  0x36   :  { %1035 = dma.done.wait [#allocation9], 1024  }
  0x37   :  { %1036 = vsyncadd [#allocation9], 4294966272  ;;  %s799_s0 = sld [smem:[#allocation4 + $0x101]]  ;;  %s1134_s21 = sld [smem:[#allocation4 + $0x82]]  ;;  %v927_v2 = vld [vmem:[#allocation5] sm:$0xff]   ;;  %v1045_v5 = vmov 0  }
  0x38   :  { %s789_s12 = sld [smem:[#allocation4 + $0x1]]  ;;  %s1044_s10 = smov 32   ;;  %466 = vmatprep.subr.bf16.mxu0 %v1045_v5  ;;  %v928_v6 = vld [vmem:[#allocation5 + $0x8] sm:$0xff]   ;;  %v929_v9 = vld [vmem:[#allocation5 + $0x10] sm:$0xff]   ;;  %v930_v14 = vld [vmem:[#allocation5 + $0x18] sm:$0xff]   ;;  %vm68_vm0 = vcmask 253952  }
  0x39   :  { %s804_s13 = sld [smem:[#allocation4 + $0x181]]  ;;  %s1150_s2 = sld [smem:[#allocation4 + $0x2]]  ;;  %467 = vmatpush1.bf16.msra.mxu0 %v927_v2  ;;  %v931_v15 = vld [vmem:[#allocation5 + $0x20] sm:$0xff]   ;;  %v932_v20 = vld [vmem:[#allocation5 + $0x28] sm:$0xff]   ;;  %v933_v24 = vld [vmem:[#allocation5 + $0x30] sm:$0xff]   ;;  %v1047_v52 = vmov 0.0  }
  0x3a   :  { %s794_s14 = sld [smem:[#allocation4 + $0x81]]  ;;  %s1152_s11 = sld [smem:[#allocation4 + $0x182]]  ;;  %468 = vmatprep.subr.bf16.mxu0 %v1045_v5  ;;  %v934_v34 = vld [vmem:[#allocation5 + $0x38] sm:$0xff]   ;;  %v935_v38 = vld [vmem:[#allocation5 + $0x40] sm:$0xff]   ;;  %v936_v39 = vld [vmem:[#allocation5 + $0x48] sm:$0xff]   ;;  %876 = vmatprep.subr.bf16.mxu1 %v1047_v52  ;;  %vm462_vm1 = vcmask 261120  }
  0x3b   :  { %s1126_s15 = sld [smem:[#allocation4 + $0x281]]  ;;  %s1180_s30 = sld [smem:[#allocation4 + $0x282]]  ;;  %vm78_vm2 = vcmask 516352   ;;  %vm88_vm3 = vcmask 778752   ;;  %vm98_vm4 = vcmask 1041152   ;;  %vm1048_vm5 = vmmov 0  }
  0x3c   :  { %s1128_s16 = sld [smem:[#allocation4 + $0x201]]  ;;  %s1201_s23 = sld [smem:[#allocation4 + $0x3]]  ;;  %892 = vmatprep.mubr.msk.bf16.mxu1 %vm1048_vm5, %v1047_v52 }
  0x3d   :  { %s1130_s17 = sld [smem:[#allocation4 + $0x381]]  ;;  %s151_s20 = scalar_lea.vmem %s1501_s1, %s799_s0  ;;  %469 = vmatpush1.bf16.msra.mxu0 %v928_v6 }
  0x3e   :  { %s1132_s18 = sld [smem:[#allocation4 + $0x301]]  ;;  %s72_s25 = scalar_lea.vmem %s1501_s1, %s789_s12  ;;  %v152_v0 = vld [vmem:[%s151_s20] sm:$0x1]  ;;  %470 = vmatprep.subr.bf16.mxu0 %v1045_v5 }
  0x3f   :  { %v73_v1 = vld [vmem:[%s72_s25] sm:$0x1]  ;;  %s189_s28 = scalar_lea.vmem %s1501_s1, %s804_s13  ;;  %154 = vrot.lane.b32.xlu1 %v152_v0, %s1044_s10  ;;  %s1163_s20 = sld [smem:[#allocation4 + $0x102]] }
  0x40   :  { %s113_s9 = scalar_lea.vmem %s1501_s1, %s794_s14  ;;  %75 = vrot.lane.b32.xlu0 %v73_v1, %s1044_s10  ;;  %v190_v3 = vld [vmem:[%s189_s28] sm:$0x1]  ;;  %s122_s29 = scalar_lea.vmem %s1501_s1, %s1134_s21 }
  0x41   :  { %v114_v4 = vld [vmem:[%s113_s9] sm:$0x1]  ;;  %s265_s13 = scalar_lea.vmem %s1501_s1, %s1126_s15  ;;  %s1182_s9 = sld [smem:[#allocation4 + $0x202]]  ;;  %471 = vmatpush1.bf16.msra.mxu0 %v929_v9 }
  0x42   :  { %s227_s6 = scalar_lea.vmem %s1501_s1, %s1128_s16  ;;  %v266_v7 = vld [vmem:[%s265_s13] sm:$0x1]  ;;  %s1184_s0 = sld [smem:[#allocation4 + $0x382]]  ;;  %472 = vmatprep.subr.bf16.mxu0 %v1045_v5 }
  0x43   :  { %192 = vrot.lane.b32.xlu1 %v190_v3, %s1044_s10  ;;  %v228_v8 = vld [vmem:[%s227_s6] sm:$0x1]  ;;  %s341_s15 = scalar_lea.vmem %s1501_s1, %s1130_s17  ;;  %s82_s21 = scalar_lea.vmem %s1501_s1, %s1150_s2 }
  0x44   :  { %116 = vrot.lane.b32.xlu0 %v114_v4, %s1044_s10  ;;  %s303_s16 = scalar_lea.vmem %s1501_s1, %s1132_s18  ;;  %v342_v10 = vld [vmem:[%s341_s15] sm:$0x1]  ;;  %s1193_s12 = sld [smem:[#allocation4 + $0x302]] }
  0x45   :  { %v304_v11 = vld [vmem:[%s303_s16] sm:$0x1]  ;;  %s1195_s13 = sld [smem:[#allocation4 + $0x83]]  ;;  %s198_s6 = scalar_lea.vmem %s1501_s1, %s1152_s11  ;;  %473 = vmatpush1.bf16.msra.mxu0 %v930_v14 }
  0x46   :  { %v123_v12 = vld [vmem:[%s122_s29] sm:$0x1]  ;;  %s160_s2 = scalar_lea.vmem %s1501_s1, %s1163_s20  ;;  %s1207_s25 = sld [smem:[#allocation4 + $0x183]]  ;;  %474 = vmatprep.subr.bf16.mxu0 %v1045_v5 }
  0x47   :  { %268 = vrot.lane.b32.xlu1 %v266_v7, %s1044_s10  ;;  %v83_v13 = vld [vmem:[%s82_s21] sm:$0x1]  ;;  %s1212_s11 = sld [smem:[#allocation4 + $0x103]]  ;;  %s274_s29 = scalar_lea.vmem %s1501_s1, %s1180_s30 }
  0x48   :  { %230 = vrot.lane.b32.xlu0 %v228_v8, %s1044_s10  ;;  %s1214_s26 = sld [smem:[#allocation4 + $0x283]]  ;;  %s236_s14 = scalar_lea.vmem %s1501_s1, %s1182_s9  ;;  %v199_v16 = vld [vmem:[%s198_s6] sm:$0x1] }
  0x49   :  { %s1216_s16 = sld [smem:[#allocation4 + $0x203]]  ;;  %s350_s24 = scalar_lea.vmem %s1501_s1, %s1184_s0  ;;  %v161_v17 = vld [vmem:[%s160_s2] sm:$0x1]  ;;  %475 = vmatpush1.bf16.msra.mxu0 %v931_v15 }
  0x4a   :  { %s1218_s27 = sld [smem:[#allocation4 + $0x383]]  ;;  %s312_s28 = scalar_lea.vmem %s1501_s1, %s1193_s12  ;;  %v275_v18 = vld [vmem:[%s274_s29] sm:$0x1]  ;;  %476 = vmatprep.subr.bf16.mxu0 %v1045_v5 }
  0x4b   :  { %344 = vrot.lane.b32.xlu1 %v342_v10, %s1044_s10  ;;  %s1224_s17 = sld [smem:[#allocation4 + $0x303]]  ;;  %s798_s20 = sld [smem:[#allocation4 + $0x100]]  ;;  %v237_v19 = vld [vmem:[%s236_s14] sm:$0x1] }
  0x4c   :  { %306 = vrot.lane.b32.xlu0 %v304_v11, %s1044_s10  ;;  %s1241_s9 = sld [smem:[#allocation4]]  ;;  %s131_s22 = scalar_lea.vmem %s1501_s1, %s1195_s13  ;;  %v351_v21 = vld [vmem:[%s350_s24] sm:$0x1] }
  0x4d   :  { %s1243_s18 = sld [smem:[#allocation4 + $0x180]]  ;;  %s92_s15 = scalar_lea.vmem %s1501_s1, %s1201_s23  ;;  %477 = vmatpush1.bf16.msra.mxu0 %v932_v20  ;;  %v313_v22 = vld [vmem:[%s312_s28] sm:$0x1] }
  0x4e   :  { %s1245_s0 = sld [smem:[#allocation4 + $0x80]]  ;;  %s207_s5 = scalar_lea.vmem %s1501_s1, %s1207_s25  ;;  %478 = vmatprep.subr.bf16.mxu0 %v1045_v5  ;;  %v132_v31 = vld [vmem:[%s131_s22] sm:$0x1] }
  0x4f   :  { %125 = vrot.lane.b32.xlu1 %v123_v12, %s1511_s19  ;;  %s1247_s21 = sld [smem:[#allocation4 + $0x280]]  ;;  %s1519_s3 = smov 64   ;;  %v93_v32 = vld [vmem:[%s92_s15] sm:$0x1] }
  0x50   :  { %85 = vrot.lane.b32.xlu0 %v83_v13, %s1511_s19  ;;  %s1249_s6 = sld [smem:[#allocation4 + $0x200]]  ;;  %s1311_s4 = sld [smem:[#allocation4 + $0x84]]  ;;  %v208_v36 = vld [vmem:[%s207_s5] sm:$0x1] }
  0x51   :  { %1518 = sst [smem:[#allocation15_spill]] %s1224_s17  ;;  %s1251_s12 = sld [smem:[#allocation4 + $0x380]]  ;;  %479 = vmatpush1.bf16.msra.mxu0 %v933_v24 }
  0x52   :  { %s1260_s29 = sld [smem:[#allocation4 + $0x300]]  ;;  %s146_s17 = scalar_lea.vmem %s1501_s1, %s798_s20  ;;  %480 = vmatprep.subr.bf16.mxu0 %v1045_v5 }
  0x53   :  { %201 = vrot.lane.b32.xlu1 %v199_v16, %s1511_s19  ;;  %v147_v23 = vld [vmem:[%s146_s17] sm:$0x1]  ;;  %s66_s14 = scalar_lea.vmem %s1501_s1, %s1241_s9  ;;  %s184_s8 = scalar_lea.vmem %s1501_s1, %s1243_s18 }
  0x54   :  { %163 = vrot.lane.b32.xlu0 %v161_v17, %s1511_s19  ;;  %s1273_s19 = sld [smem:[#allocation4 + $0x4]]  ;;  %148 = vst.msk [vmem:[#allocation2 + $0x2] sm:$0x1] %vm68_vm0, %v147_v23  ;;  %v67_v25 = vld [vmem:[%s66_s14] sm:$0x1]  ;;  %s108_s24 = scalar_lea.vmem %s1501_s1, %s1245_s0 }
  0x55   :  { %v185_v26 = vld [vmem:[%s184_s8] sm:$0x1]  ;;  %s260_s9 = scalar_lea.vmem %s1501_s1, %s1247_s21  ;;  %69 = vst.msk [vmem:[#allocation2] sm:$0x1] %vm68_vm0, %v67_v25  ;;  %s802_s13 = sld [smem:[#allocation4 + $0x104]]  ;;  %481 = vmatpush1.bf16.msra.mxu0 %v934_v34  ;;  %v947_v34 = vld [vmem:[#allocation8 + $0x10] sm:$0xff]  }
  0x56   :  { %186 = vst.msk [vmem:[#allocation2 + $0x3] sm:$0x1] %vm68_vm0, %v185_v26  ;;  %v109_v27 = vld [vmem:[%s108_s24] sm:$0x1]  ;;  %s222_s10 = scalar_lea.vmem %s1501_s1, %s1249_s6  ;;  %s1339_s15 = sld [smem:[#allocation4 + $0x204]]  ;;  %482 = vmatprep.subr.bf16.mxu0 %v1045_v5 }
  0x57   :  { %277 = vrot.lane.b32.xlu1 %v275_v18, %s1519_s3  ;;  %v261_v28 = vld [vmem:[%s260_s9] sm:$0x1]  ;;  %s336_s0 = scalar_lea.vmem %s1501_s1, %s1251_s12  ;;  %110 = vst.msk [vmem:[#allocation2 + $0x1] sm:$0x1] %vm68_vm0, %v109_v27  ;;  %s169_s9 = scalar_lea.vmem %s1501_s1, %s1212_s11 }
  0x58   :  { %239 = vrot.lane.b32.xlu0 %v237_v19, %s1519_s3  ;;  %262 = vst.msk [vmem:[#allocation2 + $0x5] sm:$0x1] %vm68_vm0, %v261_v28  ;;  %v223_v29 = vld [vmem:[%s222_s10] sm:$0x1]  ;;  %s298_s8 = scalar_lea.vmem %s1501_s1, %s1260_s29  ;;  %s1337_s29 = sld [smem:[#allocation4 + $0x184]] }
  0x59   :  { %v337_v30 = vld [vmem:[%s336_s0] sm:$0x1]  ;;  %224 = vst.msk [vmem:[#allocation2 + $0x4] sm:$0x1] %vm68_vm0, %v223_v29  ;;  %s1341_s18 = sld [smem:[#allocation4 + $0x284]]  ;;  %s283_s0 = scalar_lea.vmem %s1501_s1, %s1214_s26  ;;  %483 = vmatpush1.bf16.msra.mxu0 %v935_v38  ;;  %v951_v38 = vld [vmem:[#allocation8 + $0x30] sm:$0xff]  }
  0x5a   :  { %338 = vst.msk [vmem:[#allocation2 + $0x7] sm:$0x1] %vm68_vm0, %v337_v30  ;;  %v299_v33 = vld [vmem:[%s298_s8] sm:$0x1]  ;;  %s102_s11 = scalar_lea.vmem %s1501_s1, %s1273_s19  ;;  %s1344_s2 = sld [smem:[#allocation4 + $0x304]]  ;;  %484 = vmatprep.subr.bf16.mxu0 %v1045_v5 }
  0x5b   :  { %353 = vrot.lane.b32.xlu1 %v351_v21, %s1519_s3  ;;  %300 = vst.msk [vmem:[#allocation2 + $0x6] sm:$0x1] %vm68_vm0, %v299_v33  ;;  %v103_v35 = vld [vmem:[%s102_s11] sm:$0x1]  ;;  %s1046_s21 = smov 96   ;;  %s245_s5 = scalar_lea.vmem %s1501_s1, %s1216_s16  ;;  %v946_v33 = vld [vmem:[#allocation8 + $0x8] sm:$0xff]  }
  0x5c   :  { %315 = vrot.lane.b32.xlu0 %v313_v22, %s1519_s3  ;;  %104 = vst.msk [vmem:[#allocation2 + $0x8] sm:$0x1] %vm68_vm0, %v103_v35  ;;  %s1346_s3 = sld [smem:[#allocation4 + $0x384]]  ;;  %v170_v37 = vld [vmem:[%s169_s9] sm:$0x1]  ;;  %s140_s6 = scalar_lea.vmem %s1501_s1, %s1311_s4  ;;  %v948_v35 = vld [vmem:[#allocation8 + $0x18] sm:$0xff]  }
  0x5d   :  { %v141_v40 = vld [vmem:[%s140_s6] sm:$0x1]  ;;  %s178_s24 = scalar_lea.vmem %s1501_s1, %s802_s13  ;;  %s1520_s4 = sld [smem:[#allocation15_spill]]  ;;  %485 = vmatpush1.bf16.msra.mxu0 %v936_v39  ;;  %v952_v39 = vld [vmem:[#allocation8 + $0x38] sm:$0xff]  }
  0x5e   :  { %142 = vst.msk [vmem:[#allocation2 + $0x9] sm:$0x1] %vm68_vm0, %v141_v40  ;;  %v179_v41 = vld [vmem:[%s178_s24] sm:$0x1]  ;;  %s216_s16 = scalar_lea.vmem %s1501_s1, %s1337_s29  ;;  %s254_s23 = scalar_lea.vmem %s1501_s1, %s1339_s15 }
  0x5f   :  { %134 = vrot.lane.b32.xlu1 %v132_v31, %s1046_s21  ;;  %v284_v42 = vld [vmem:[%s283_s0] sm:$0x1]  ;;  %180 = vst.msk [vmem:[#allocation2 + $0xa] sm:$0x1] %vm68_vm0, %v179_v41  ;;  %s292_s10 = scalar_lea.vmem %s1501_s1, %s1341_s18  ;;  %s359_s8 = scalar_lea.vmem %s1501_s1, %s1218_s27 }
  0x60   :  { %95 = vrot.lane.b32.xlu0 %v93_v32, %s1046_s21  ;;  %v246_v43 = vld [vmem:[%s245_s5] sm:$0x1]  ;;  %s330_s19 = scalar_lea.vmem %s1501_s1, %s1344_s2  ;;  %s1521_s6 = sld [smem:[#allocation17_spill]] }
  0x61   :  { %v217_v44 = vld [vmem:[%s216_s16] sm:$0x1]  ;;  %s1522_s29 = sld [smem:[#allocation16_spill]]  ;;  %s1523_s30 = sld [smem:[#allocation18_spill]] }
  0x62   :  { %218 = vst.msk [vmem:[#allocation2 + $0xb] sm:$0x1] %vm68_vm0, %v217_v44  ;;  %v255_v45 = vld [vmem:[%s254_s23] sm:$0x1]  ;;  %s368_s15 = scalar_lea.vmem %s1501_s1, %s1346_s3  ;;  %s1524_s18 = sld [smem:[#allocation19_spill]] }
  0x63   :  { %210 = vrot.lane.b32.xlu1 %v208_v36, %s1046_s21  ;;  %v293_v46 = vld [vmem:[%s292_s10] sm:$0x1]  ;;  %256 = vst.msk [vmem:[#allocation2 + $0xc] sm:$0x1] %vm68_vm0, %v255_v45  ;;  %s321_s17 = scalar_lea.vmem %s1501_s1, %s1520_s4  ;;  %s1049_s7 = smov [#allocation10]  }
  0x64   :  { %172 = vrot.lane.b32.xlu0 %v170_v37, %s1046_s21  ;;  %294 = vst.msk [vmem:[#allocation2 + $0xd] sm:$0x1] %vm68_vm0, %v293_v46  ;;  %v331_v47 = vld [vmem:[%s330_s19] sm:$0x1]  ;;  %v950_v37 = vld [vmem:[#allocation8 + $0x28] sm:$0xff]  }
  0x65   :  { %v369_v48 = vld [vmem:[%s368_s15] sm:$0x1]  ;;  %332 = vst.msk [vmem:[#allocation2 + $0xe] sm:$0x1] %vm68_vm0, %v331_v47 }
  0x66   :  { %370 = vst.msk [vmem:[#allocation2 + $0xf] sm:$0x1] %vm68_vm0, %v369_v48  ;;  %v360_v49 = vld [vmem:[%s359_s8] sm:$0x1]  ;;  %v938_v53 = vld [vmem:[%s1521_s6 + $0x8] sm:$0xff]   ;;  %v939_v56 = vld [vmem:[%s1521_s6 + $0x10] sm:$0xff]  }
  0x67   :  { %286 = vrot.lane.b32.xlu1 %v284_v42, %s1046_s21  ;;  %v322_v50 = vld [vmem:[%s321_s17] sm:$0x1]  ;;  %v940_v57 = vld [vmem:[%s1521_s6 + $0x18] sm:$0xff]   ;;  %v942_v59 = vld [vmem:[%s1521_s6 + $0x28] sm:$0xff]   ;;  %s739_s8 = sshll.u32 %s1049_s7, 4  ;;  %s740_s8 = int_to_ptr.vmem [resolvable:$true] %s739_s8 }
  0x68   :  { %248 = vrot.lane.b32.xlu0 %v246_v43, %s1046_s21  ;;  %v937_v51 = vld [vmem:[%s1521_s6] sm:$0xff]   ;;  %v943_v22 = vld [vmem:[%s1521_s6 + $0x30] sm:$0xff]   ;;  %v944_v23 = vld [vmem:[%s1521_s6 + $0x38] sm:$0xff]   ;;  %s1009_s5 = scalar_lea.vmem %s740_s8, 128  ;;  %p1014_p8 = scmp.lt.s32.totalorder %s740_s8, %s740_s8 }
  0x69   :  { %877 = vmatpush3.bf16.msra.mxu1 %v937_v51  ;;  %v941_v58 = vld [vmem:[%s1521_s6 + $0x20] sm:$0xff]   ;;  %p1010_p7 = scmp.ne.s32.totalorder %s740_s8, %s1009_s5  ;;  %p1015_p9 = scmp.lt.s32.totalorder %s1009_s5, %s1009_s5 }
  0x6a   :  { %878 = vmatprep.subr.bf16.mxu1 %v1047_v52  ;;  %v828_v24 = vld [vmem:[%s1522_s29] ss:$0 sm:$0xff] }
  0x6b   :  { %362 = vrot.lane.b32.xlu1 %v360_v49, %s1046_s21  ;;  %v945_v31 = vld [vmem:[#allocation8] sm:$0xff]   ;;  %p1016_p10 = por %p1015_p9, %p1014_p8 }
  0x6c   :  { %324 = vrot.lane.b32.xlu0 %v322_v50, %s1046_s21  ;;  %v949_v36 = vld [vmem:[#allocation8 + $0x20] sm:$0xff]  }
  0x6d   :  { %v372_v54 = vld [vmem:[#allocation2 + $0x8] sm:$0xff]  ;;  %879 = vmatpush3.bf16.msra.mxu1 %v938_v53  ;;  %v840_v40 = vld [vmem:[%s1523_s30] ss:$0 sm:$0xff]  ;;  %p1017_p11 = pnand %p1016_p10, %p1010_p7 }
  0x6e   :  { %v374_v55 = vpack.c.bf16 %v372_v54, %v372_v54  ;;  %880 = vmatprep.subr.bf16.mxu1 %v1047_v52  ;;  %v849_v48 = vld [vmem:[%s1524_s18] ss:$0 sm:$0xff] }
  0x70   :  { %839 = vmatprep.mubr.msk.bf16.mxu0 %vm462_vm1, %v374_v55 }
  0x71   :  { %881 = vmatpush3.bf16.msra.mxu1 %v939_v56 }
  0x72   :  { %882 = vmatprep.subr.bf16.mxu1 %v1047_v52 }
  0x75   :  { %883 = vmatpush3.bf16.msra.mxu1 %v940_v57 }
  0x76   :  { %884 = vmatprep.subr.bf16.mxu1 %v1047_v52 }
  0x79   :  { %885 = vmatpush3.bf16.msra.mxu1 %v941_v58 }
  0x7a   :  { %886 = vmatprep.subr.bf16.mxu1 %v1047_v52 }
  0x7d   :  { %887 = vmatpush3.bf16.msra.mxu1 %v942_v59 }
  0x7e   :  { %888 = vmatprep.subr.bf16.mxu1 %v1047_v52 }
  0x81   :  { %889 = vmatpush3.bf16.msra.mxu1 %v943_v22 }
  0x82   :  { %890 = vmatprep.subr.bf16.mxu1 %v1047_v52 }
  0x85   :  { %891 = vmatpush3.bf16.msra.mxu1 %v944_v23 }
  0x86   :  { %896 = vmatprep.subr.bf16.mxu1 %v1047_v52 }
  0xb1   :  { %v155_v60 = vpop.permute.xlu1 %154 }
  0xb2   :  { %v76_v61 = vpop.permute.xlu0 %75  ;;  %157 = vst.msk [vmem:[#allocation2 + $0x2] sm:$0x1] %vm78_vm2, %v155_v60 }
  0xb3   :  { %79 = vst.msk [vmem:[#allocation2] sm:$0x1] %vm78_vm2, %v76_v61 }
  0xb5   :  { %v193_v62 = vpop.permute.xlu1 %192 }
  0xb6   :  { %v117_v63 = vpop.permute.xlu0 %116  ;;  %195 = vst.msk [vmem:[#allocation2 + $0x3] sm:$0x1] %vm78_vm2, %v193_v62 }
  0xb7   :  { %119 = vst.msk [vmem:[#allocation2 + $0x1] sm:$0x1] %vm78_vm2, %v117_v63 }
  0xb9   :  { %v269_v0 = vpop.permute.xlu1 %268 }
  0xba   :  { %v231_v1 = vpop.permute.xlu0 %230  ;;  %271 = vst.msk [vmem:[#allocation2 + $0x5] sm:$0x1] %vm78_vm2, %v269_v0 }
  0xbb   :  { %233 = vst.msk [vmem:[#allocation2 + $0x4] sm:$0x1] %vm78_vm2, %v231_v1 }
  0xbd   :  { %v345_v2 = vpop.permute.xlu1 %344 }
  0xbe   :  { %v307_v3 = vpop.permute.xlu0 %306  ;;  %347 = vst.msk [vmem:[#allocation2 + $0x7] sm:$0x1] %vm78_vm2, %v345_v2 }
  0xbf   :  { %309 = vst.msk [vmem:[#allocation2 + $0x6] sm:$0x1] %vm78_vm2, %v307_v3 }
  0xc1   :  { %v126_v4 = vpop.permute.xlu1 %125 }
  0xc2   :  { %v86_v5 = vpop.permute.xlu0 %85  ;;  %128 = vst.msk [vmem:[#allocation2 + $0x1] sm:$0x1] %vm88_vm3, %v126_v4 }
  0xc3   :  { %89 = vst.msk [vmem:[#allocation2] sm:$0x1] %vm88_vm3, %v86_v5 }
  0xc5   :  { %v202_v6 = vpop.permute.xlu1 %201 }
  0xc6   :  { %v164_v7 = vpop.permute.xlu0 %163  ;;  %204 = vst.msk [vmem:[#allocation2 + $0x3] sm:$0x1] %vm88_vm3, %v202_v6 }
  0xc7   :  { %166 = vst.msk [vmem:[#allocation2 + $0x2] sm:$0x1] %vm88_vm3, %v164_v7 }
  0xc9   :  { %v278_v8 = vpop.permute.xlu1 %277 }
  0xca   :  { %v240_v9 = vpop.permute.xlu0 %239  ;;  %280 = vst.msk [vmem:[#allocation2 + $0x5] sm:$0x1] %vm88_vm3, %v278_v8 }
  0xcb   :  { %242 = vst.msk [vmem:[#allocation2 + $0x4] sm:$0x1] %vm88_vm3, %v240_v9 }
  0xcd   :  { %v354_v10 = vpop.permute.xlu1 %353 }
  0xce   :  { %v316_v11 = vpop.permute.xlu0 %315  ;;  %356 = vst.msk [vmem:[#allocation2 + $0x7] sm:$0x1] %vm88_vm3, %v354_v10 }
  0xcf   :  { %318 = vst.msk [vmem:[#allocation2 + $0x6] sm:$0x1] %vm88_vm3, %v316_v11 }
  0xd1   :  { %v135_v12 = vpop.permute.xlu1 %134 }
  0xd2   :  { %v96_v13 = vpop.permute.xlu0 %95  ;;  %137 = vst.msk [vmem:[#allocation2 + $0x1] sm:$0x1] %vm98_vm4, %v135_v12 }
  0xd3   :  { %99 = vst.msk [vmem:[#allocation2] sm:$0x1] %vm98_vm4, %v96_v13 }
  0xd5   :  { %v211_v14 = vpop.permute.xlu1 %210 }
  0xd6   :  { %v173_v15 = vpop.permute.xlu0 %172  ;;  %213 = vst.msk [vmem:[#allocation2 + $0x3] sm:$0x1] %vm98_vm4, %v211_v14 }
  0xd7   :  { %175 = vst.msk [vmem:[#allocation2 + $0x2] sm:$0x1] %vm98_vm4, %v173_v15 }
  0xd9   :  { %v287_v16 = vpop.permute.xlu1 %286 }
  0xda   :  { %v249_v17 = vpop.permute.xlu0 %248  ;;  %289 = vst.msk [vmem:[#allocation2 + $0x5] sm:$0x1] %vm98_vm4, %v287_v16 }
  0xdb   :  { %251 = vst.msk [vmem:[#allocation2 + $0x4] sm:$0x1] %vm98_vm4, %v249_v17 }
  0xdd   :  { %v363_v18 = vpop.permute.xlu1 %362 }
  0xde   :  { %v325_v19 = vpop.permute.xlu0 %324  ;;  %365 = vst.msk [vmem:[#allocation2 + $0x7] sm:$0x1] %vm98_vm4, %v363_v18 }
  0xdf   :  { %327 = vst.msk [vmem:[#allocation2 + $0x6] sm:$0x1] %vm98_vm4, %v325_v19 }
  0xe6   :  { %v371_v20 = vld [vmem:[#allocation2] sm:$0xff] }
  0xe7   :  { %v373_v21 = vpack.c.bf16 %v371_v20, %v371_v20 }
  0xe9   :  { %499 = vmatmul.mubr.bf16.vlgmr.msra.gmra.mrb[0].mxu0 %v373_v21 }
 0x1bc   :  { %v500_v25 = vpop.f32.mrb[0].mxu0 }
 0x1bd   :  { %v501_v26 = vadd.f32 %v828_v24, %v500_v25  ;;  %v502_v27 = vpop.f32.mrb[1].mxu0 }
 0x1be   :  { %v503_v28 = vpop.f32.mrb[2].mxu0 }
 0x1bf   :  { %v506_v29 = vmax.f32 %v501_v26, 0.0  ;;  %v504_v30 = vpop.f32.mrb[3].mxu0 }
 0x1c1   :  { %v507_v32 = vpack.c.bf16 %v506_v29, %v506_v29 }
 0x1c3   :  { %893 = vmatmul.mubr.bf16.vlgmr.msra.gmra.mrb[0].mxu1 %v507_v32 }
 0x1c4   :  { %897 = vmatpush3.bf16.msra.mxu1 %v945_v31  ;;  %912 = vmatprep.mubr.msk.bf16.mxu1 %vm1048_vm5, %v1047_v52 }
 0x1c5   :  { %898 = vmatprep.subr.bf16.mxu1 %v1047_v52 }
 0x1c8   :  { %899 = vmatpush3.bf16.msra.mxu1 %v946_v33 }
 0x1c9   :  { %900 = vmatprep.subr.bf16.mxu1 %v1047_v52 }
 0x1cc   :  { %901 = vmatpush3.bf16.msra.mxu1 %v947_v34 }
 0x1cd   :  { %902 = vmatprep.subr.bf16.mxu1 %v1047_v52 }
 0x1d0   :  { %903 = vmatpush3.bf16.msra.mxu1 %v948_v35 }
 0x1d1   :  { %904 = vmatprep.subr.bf16.mxu1 %v1047_v52 }
 0x1d4   :  { %905 = vmatpush3.bf16.msra.mxu1 %v949_v36 }
 0x1d5   :  { %906 = vmatprep.subr.bf16.mxu1 %v1047_v52 }
 0x1d8   :  { %907 = vmatpush3.bf16.msra.mxu1 %v950_v37 }
 0x1d9   :  { %908 = vmatprep.subr.bf16.mxu1 %v1047_v52 }
 0x1dc   :  { %909 = vmatpush3.bf16.msra.mxu1 %v951_v38 }
 0x1dd   :  { %910 = vmatprep.subr.bf16.mxu1 %v1047_v52 }
 0x1e0   :  { %911 = vmatpush3.bf16.msra.mxu1 %v952_v39 }
 0x296   :  { %v613_v41 = vpop.f32.mrb[0].mxu1 }
 0x297   :  { %v614_v42 = vadd.f32 %v840_v40, %v613_v41  ;;  %v894_v43 = vpop.f32.mrb[1].mxu1 }
 0x298   :  { %v616_v44 = vpop.f32.mrb[2].mxu1 }
 0x299   :  { %v619_v45 = vmax.f32 %v614_v42, 0.0  ;;  %v895_v46 = vpop.f32.mrb[3].mxu1 }
 0x29b   :  { %v620_v47 = vpack.c.bf16 %v619_v45, %v619_v45 }
 0x29d   :  { %913 = vmatmul.mubr.bf16.vlgmr.msra.gmra.mrb[4].mxu1 %v620_v47 }
 0x370   :  { %v726_v49 = vpop.f32.mrb[4].mxu1 }
 0x371   :  { %v727_v50 = vadd.f32 %v849_v48, %v726_v49  ;;  %v914_v51 = vpop.f32.mrb[5].mxu1 }
 0x372   :  { %v729_v52 = vpop.f32.mrb[6].mxu1 }
 0x373   :  { %732 = vst [vmem:[#allocation10] sm:$0xff] %v727_v50  ;;  %v915_v53 = vpop.f32.mrb[7].mxu1 }
 0x374   :  { %1020 = shalt.err (!%p1017_p11)
}
 0x375   :  { %s1525_s2 = sld [smem:[#allocation20_spill]] }
 0x37b   :  { %s1021_s3 = scalar_lea.hbm %s1525_s2, 128 }
 0x37c   :  { %p1022_p12 = scmp.ne.s32.totalorder %s1525_s2, %s1021_s3  ;;  %p1025_p13 = scmp.lt.u32.totalorder %s1021_s3, %s1525_s2 }
 0x37e   :  { %p1027_p0 = pnand %p1025_p13, %p1022_p12 }
 0x380   :  { %1030 = shalt.err (!%p1027_p0)
}
 0x381   :  { %742 = dma.vmem_to_hbm [thread:$0]  %s740_s8, 128, %s1525_s2, [#allocation7]  }
 0x382   :  { %1037 = dma.done.wait [#allocation7], 128  }
 0x383   :  { %1038 = vsyncadd [#allocation7], 4294967168 }
 0x384   :  { %746 = vsyncpa [#allocation6], 1 }
 0x385   :  { %747 = vsyncpa [#allocation9], 1 }
 0x386   :  { %748 = vsyncpa [#allocation7], 1 }

</bundles_post_ra>
